<compile_context>
chip_gen: v5e
topology: v5e:2x2
jax: 0.10.0
libtpu: 0.0.40
codegen_flags: <defaults>
</compile_context>

<pallas_src>
import math
import jax
import jax.numpy as jnp
from jax.experimental import pallas as pl
from jax.experimental.pallas import tpu as pltpu

_BF16 = jnp.bfloat16


def _round_up(x, m):
    return ((x + m - 1) // m) * m


def _vmem_capacity_bytes():
    try:
        return int(pltpu.get_tpu_info().vmem_capacity_bytes)
    except Exception:
        return 64 << 20            # conservative fallback (v7x physical VMEM)


def _vmem_limit(need_bytes):
    # ~85% of physical VMEM: ~54 MiB on v7x (64 MiB), ~108 MiB on v5e/v6e (128 MiB).
    cap = (_vmem_capacity_bytes() * 85) // 100
    cap = max(cap, 32 << 20)
    return int(min(max(need_bytes, 32 << 20), cap))


def _gelu_exact(x):
    # GELU(x) = 0.5 x (1 + erf(x/sqrt(2))) with erf via Abramowitz-Stegun 7.1.26
    # (|abs err| <= 1.5e-7), using only exp / mul / add / where (robust lowering).
    z = x * (1.0 / math.sqrt(2.0))
    za = jnp.abs(z)
    t = 1.0 / (1.0 + 0.3275911 * za)
    poly = ((((1.061405429 * t - 1.453152027) * t + 1.421413741) * t
             - 0.284496736) * t + 0.254829592) * t
    erf_abs = 1.0 - poly * jnp.exp(-za * za)
    erf_z = jnp.where(z >= 0.0, erf_abs, -erf_abs)
    return 0.5 * x * (1.0 + erf_z)


# ----------------------------------------------------------------------------
# Patch-embed matmul: (M, K) @ (K, E) + bias, tiled over M, bf16 MXU inputs
# ----------------------------------------------------------------------------
def _patch_embed_kernel(x_ref, w_ref, b_ref, o_ref):
    acc = jnp.dot(x_ref[...], w_ref[...], preferred_element_type=jnp.float32)
    o_ref[...] = acc + b_ref[...]


def patch_embed_matmul(patches, w, b, *, tile_m=512):
    M, K = patches.shape
    E = w.shape[1]
    tile_m = min(tile_m, _round_up(M, 8))
    m_pad = _round_up(M, tile_m)
    x = patches.astype(_BF16)
    if m_pad != M:
        x = jnp.pad(x, ((0, m_pad - M), (0, 0)))
    need = (2 * (tile_m * K * 2) + 2 * (K * E * 2)
            + 2 * (tile_m * E * 4) + 2 * (E * 4) + (2 << 20))
    out = pl.pallas_call(
        _patch_embed_kernel,
        out_shape=jax.ShapeDtypeStruct((m_pad, E), jnp.float32),
        grid=(m_pad // tile_m,),
        in_specs=[
            pl.BlockSpec((tile_m, K), lambda i: (i, 0)),
            pl.BlockSpec((K, E), lambda i: (0, 0)),
            pl.BlockSpec((1, E), lambda i: (0, 0)),
        ],
        out_specs=pl.BlockSpec((tile_m, E), lambda i: (i, 0)),
        compiler_params=pltpu.CompilerParams(
            dimension_semantics=("parallel",),
            vmem_limit_bytes=_vmem_limit(need)),
    )(x, w.astype(_BF16), b.reshape(1, E).astype(jnp.float32))
    return out[:M]


# ----------------------------------------------------------------------------
# Fused transformer stack: grid=(B, depth); residual stream lives in VMEM
# across the whole depth loop (output revisit), per-block weights indexed by d.
# ----------------------------------------------------------------------------
def _make_blocks_kernel(num_heads, head_dim, eps=1e-6):
    H, hd = num_heads, head_dim
    C = H * hd
    scale = head_dim ** (-0.5)
    inv_ddof = 1.0 / max(head_dim - 1, 1)     # torch.std uses ddof=1

    def kernel(x_ref, ln1w, ln1b, wqkv, bqkv, wproj, bproj,
               ln2w, ln2b, w1, b1, w2, b2, o_ref):
        d = pl.program_id(1)

        # depth == 0: pull this image's tokens into the VMEM-resident output
        # block; for d > 0 the residual stream is read straight back from it.
        @pl.when(d == 0)
        def _init():
            o_ref[0] = x_ref[0]

        x = o_ref[0]                           # (N, C) f32 residual stream

        # ---- LayerNorm 1 (biased variance, eps=1e-6); rsqrt -> EUP ----
        mu = jnp.mean(x, axis=-1, keepdims=True)
        var = jnp.mean((x - mu) ** 2, axis=-1, keepdims=True)
        xn = (x - mu) * jax.lax.rsqrt(var + eps) * ln1w[0] + ln1b[0]

        # ---- fused qkv projection: bf16 MXU, f32 accumulation (full K=C) ----
        qkv = jnp.dot(xn.astype(_BF16), wqkv[0],
                      preferred_element_type=jnp.float32) + bqkv[0]   # (N, 3C)

        # ---- multi-head softmax attention ----
        # TODO(synk): a single structured relayout to a head-major (H, N, hd)
        # layout (pltpu.einshape) would replace the per-head lane slices below
        # with batched einsums; kept per-head (with register concat, no scratch,
        # no explicit transposes, scale folded into q) for robust lowering.
        head_outs = []
        for h in range(H):
            off = h * hd
            qh = qkv[:, off:off + hd]
            kh = qkv[:, C + off:C + off + hd]
            vh = qkv[:, 2 * C + off:2 * C + off + hd]

            # per-token standardization over head_dim (sample std, ddof=1,
            # no eps -- matches torch (q - mean) / std)
            qm = jnp.mean(qh, axis=-1, keepdims=True)
            qc = qh - qm
            # fold the attention scale into q's rsqrt factor (VPU work moves
            # from the N*N score domain to the N*hd domain)
            qh = qc * (jax.lax.rsqrt(
                jnp.sum(qc * qc, axis=-1, keepdims=True) * inv_ddof) * scale)
            km = jnp.mean(kh, axis=-1, keepdims=True)
            kc = kh - km
            kh = kc * jax.lax.rsqrt(
                jnp.sum(kc * kc, axis=-1, keepdims=True) * inv_ddof)

            # q @ k^T without materializing a transpose: contract minor dims
            s = jax.lax.dot_general(
                qh.astype(_BF16), kh.astype(_BF16),
                dimension_numbers=(((1,), (1,)), ((), ())),
                preferred_element_type=jnp.float32)                  # (N, N)
            s = s - jnp.max(s, axis=-1, keepdims=True)
            p = jnp.exp(s)
            p = p * pl.reciprocal(jnp.sum(p, axis=-1, keepdims=True),
                                  approx=True)
            head_outs.append(jnp.dot(p.astype(_BF16), vh.astype(_BF16),
                                     preferred_element_type=jnp.float32))

        # register concat of head outputs; single full-K output projection
        attn = jnp.concatenate(head_outs, axis=-1)                    # (N, C)
        proj = jnp.dot(attn.astype(_BF16), wproj[0],
                       preferred_element_type=jnp.float32) + bproj[0]
        x1 = x + proj                           # residual 1 (f32)

        # ---- LayerNorm 2 ----
        mu2 = jnp.mean(x1, axis=-1, keepdims=True)
        var2 = jnp.mean((x1 - mu2) ** 2, axis=-1, keepdims=True)
        xn2 = (x1 - mu2) * jax.lax.rsqrt(var2 + eps) * ln2w[0] + ln2b[0]

        # ---- MLP: bf16 matmuls (full K), exact-erf GELU in f32 ----
        h1 = jnp.dot(xn2.astype(_BF16), w1[0],
                     preferred_element_type=jnp.float32) + b1[0]
        h1 = _gelu_exact(h1)
        h2 = jnp.dot(h1.astype(_BF16), w2[0],
                     preferred_element_type=jnp.float32) + b2[0]

        o_ref[0] = x1 + h2                      # residual 2, stays VMEM-resident

    return kernel


def _block_vmem_need(N, C, hidden, H):
    w_bf16 = 2 * (3 * C * C + C * C + 2 * C * hidden)   # one block's bf16 weights
    w_f32 = 4 * (8 * C + hidden)                         # biases / LN params
    io = 4 * (4 * N * C)                                 # in/out token blocks
    act = 4 * (10 * N * C + 3 * N * hidden + 3 * H * N * N)
    return 2 * (w_bf16 + w_f32) + io + act + (4 << 20)


def run_blocks(x, stacked, *, num_heads):
    B, N, C = x.shape
    depth = stacked["wqkv"].shape[0]
    hidden = stacked["w1"].shape[2]
    kernel = _make_blocks_kernel(num_heads, C // num_heads)
    limit = _vmem_limit(_block_vmem_need(N, C, hidden, num_heads))

    def dspec(shape):   # per-depth stacked weight, indexed by the depth axis
        return pl.BlockSpec((1,) + shape, lambda b, d: (d, 0, 0))

    in_specs = [
        pl.BlockSpec((1, N, C), lambda b, d: (b, 0, 0)),   # tokens (per image)
        dspec((1, C)), dspec((1, C)),                      # ln1 w, b     (f32)
        dspec((C, 3 * C)), dspec((1, 3 * C)),              # qkv w (bf16), b
        dspec((C, C)), dspec((1, C)),                      # proj w (bf16), b
        dspec((1, C)), dspec((1, C)),                      # ln2 w, b     (f32)
        dspec((C, hidden)), dspec((1, hidden)),            # fc1 w (bf16), b
        dspec((hidden, C)), dspec((1, C)),                 # fc2 w (bf16), b
    ]
    return pl.pallas_call(
        kernel,
        out_shape=jax.ShapeDtypeStruct((B, N, C), jnp.float32),
        grid=(B, depth),
        in_specs=in_specs,
        out_specs=pl.BlockSpec((1, N, C), lambda b, d: (b, 0, 0)),
        compiler_params=pltpu.CompilerParams(
            dimension_semantics=("parallel", "arbitrary"),
            vmem_limit_bytes=limit),
    )(x, stacked["ln1w"], stacked["ln1b"], stacked["wqkv"], stacked["bqkv"],
      stacked["wproj"], stacked["bproj"], stacked["ln2w"], stacked["ln2b"],
      stacked["w1"], stacked["b1"], stacked["w2"], stacked["b2"])


# ----------------------------------------------------------------------------
# Final LayerNorm (cls token) + classifier head (lane-dense padded output)
# ----------------------------------------------------------------------------
def _ln_head_kernel(x_ref, gw, gb, wh, bh, o_ref, *, eps=1e-6):
    x = x_ref[...]                              # (B, C) cls tokens
    mu = jnp.mean(x, axis=-1, keepdims=True)
    var = jnp.mean((x - mu) ** 2, axis=-1, keepdims=True)
    xn = (x - mu) * jax.lax.rsqrt(var + eps) * gw[...] + gb[...]
    o_ref[...] = jnp.dot(xn.astype(_BF16), wh[...],
                         preferred_element_type=jnp.float32) + bh[...]


def ln_head(cls_tok, norm_w, norm_b, head_w, head_b):
    B, C = cls_tok.shape
    K = head_w.shape[1]
    k_pad = _round_up(max(K, 128), 128)         # lane-dense output slab
    wh = jnp.zeros((C, k_pad), _BF16).at[:, :K].set(head_w.astype(_BF16))
    bh = jnp.zeros((1, k_pad), jnp.float32).at[0, :K].set(head_b)
    need = 2 * (B * C * 4 + 2 * C * 4 + C * k_pad * 2 + k_pad * 4
                + B * k_pad * 4) + (2 << 20)
    out = pl.pallas_call(
        _ln_head_kernel,
        out_shape=jax.ShapeDtypeStruct((B, k_pad), jnp.float32),
        grid=(1,),
        in_specs=[
            pl.BlockSpec((B, C), lambda i: (0, 0)),
            pl.BlockSpec((1, C), lambda i: (0, 0)),
            pl.BlockSpec((1, C), lambda i: (0, 0)),
            pl.BlockSpec((C, k_pad), lambda i: (0, 0)),
            pl.BlockSpec((1, k_pad), lambda i: (0, 0)),
        ],
        out_specs=pl.BlockSpec((B, k_pad), lambda i: (0, 0)),
        compiler_params=pltpu.CompilerParams(
            vmem_limit_bytes=_vmem_limit(need)),
    )(cls_tok, norm_w, norm_b, wh, bh)
    return out[:, :K]


# ----------------------------------------------------------------------------
# Full forward pass (glue in JAX, compute in Pallas)
# ----------------------------------------------------------------------------
def vit_forward(x, params, *, patch_size, num_heads):
    B, Cin, H, W = x.shape
    E = params["conv_w"].shape[0]
    p = patch_size
    Hp, Wp = H // p, W // p

    # patch extraction, flatten order (C, p, p) to match Conv2d weight layout
    patches = (x.reshape(B, Cin, Hp, p, Wp, p)
                 .transpose(0, 2, 4, 1, 3, 5)
                 .reshape(B * Hp * Wp, Cin * p * p))
    w_pe = params["conv_w"].reshape(E, Cin * p * p).T            # (K, E)
    tokens = patch_embed_matmul(patches, w_pe, params["conv_b"]).reshape(B, Hp * Wp, E)

    cls = jnp.broadcast_to(params["cls_token"], (B, 1, E))
    xtok = jnp.concatenate([cls, tokens], axis=1) + params["pos_embed"]  # pos_drop = identity

    # stack per-block params along a leading depth axis; weights pre-cast to bf16
    blocks = params["blocks"]

    def stack(key, dtype=None):
        a = jnp.stack([blk[key] for blk in blocks], axis=0)
        return a.astype(dtype) if dtype is not None else a

    stacked = {
        "ln1w": stack("ln1w"), "ln1b": stack("ln1b"),
        "wqkv": stack("wqkv", _BF16), "bqkv": stack("bqkv"),
        "wproj": stack("wproj", _BF16), "bproj": stack("bproj"),
        "ln2w": stack("ln2w"), "ln2b": stack("ln2b"),
        "w1": stack("w1", _BF16), "b1": stack("b1"),
        "w2": stack("w2", _BF16), "b2": stack("b2"),
    }
    xtok = run_blocks(xtok, stacked, num_heads=num_heads)

    cls_out = xtok[:, 0, :]                                      # pre_logits = Identity
    return ln_head(cls_out, params["norm_w"], params["norm_b"],
                   params["head_w"], params["head_b"])


# ----------------------------------------------------------------------------
# Deterministic synthetic parameter init
# ----------------------------------------------------------------------------
def init_params(key, *, in_chans, patch_size, embed_dim, depth, mlp_ratio,
                num_patches, num_classes):
    E = embed_dim
    hidden = int(E * mlp_ratio)
    N = num_patches + 1
    ks = list(jax.random.split(key, 8 + depth))
    nrm = lambda k, shape, std=0.02: std * jax.random.normal(k, shape, dtype=jnp.float32)

    params = {
        "conv_w": nrm(ks[0], (E, in_chans, patch_size, patch_size)),
        "conv_b": nrm(ks[1], (E,)),
        "cls_token": nrm(ks[2], (1, 1, E)),
        "pos_embed": nrm(ks[3], (1, N, E)),
        "norm_w": jnp.ones((1, E), jnp.float32),
        "norm_b": jnp.zeros((1, E), jnp.float32),
        "head_w": nrm(ks[4], (E, num_classes)),
        "head_b": nrm(ks[5], (num_classes,)),
        "blocks": [],
    }
    for d in range(depth):
        kk = jax.random.split(ks[6 + d], 8)
        params["blocks"].append({
            "ln1w": jnp.ones((1, E), jnp.float32),
            "ln1b": jnp.zeros((1, E), jnp.float32),
            "wqkv": nrm(kk[0], (E, 3 * E)),
            "bqkv": nrm(kk[1], (1, 3 * E)),        # qkv_bias=True
            "wproj": nrm(kk[2], (E, E)),
            "bproj": nrm(kk[3], (1, E)),
            "ln2w": jnp.ones((1, E), jnp.float32),
            "ln2b": jnp.zeros((1, E), jnp.float32),
            "w1": nrm(kk[4], (E, hidden)),
            "b1": nrm(kk[5], (1, hidden)),
            "w2": nrm(kk[6], (hidden, E)),
            "b2": nrm(kk[7], (1, E)),
        })
    return params


if __name__ == "__main__":
    # Small, forward-consistent config
    B, Cin, H, W = 2, 3, 16, 16
    patch_size, embed_dim, depth, num_heads = 4, 32, 2, 4
    mlp_ratio, num_classes = 4.0, 10
    num_patches = (H // patch_size) * (W // patch_size)   # 16 -> seq_len 17

    key = jax.random.PRNGKey(0)
    kx, kp = jax.random.split(key)
    x = jax.random.normal(kx, (B, Cin, H, W), dtype=jnp.float32)

    params = init_params(kp, in_chans=Cin, patch_size=patch_size, embed_dim=embed_dim,
                         depth=depth, mlp_ratio=mlp_ratio, num_patches=num_patches,
                         num_classes=num_classes)

    logits = vit_forward(x, params, patch_size=patch_size, num_heads=num_heads)
    logits = jax.block_until_ready(logits)

    assert logits.shape == (B, num_classes)
    assert bool(jnp.all(jnp.isfinite(logits)))
    print("KERNEL_OK")
</pallas_src>

<mosaic_0001>
module attributes {stable_mosaic.version = 11 : i64} {
  func.func @_patch_embed_kernel(%arg0: i32, %arg1: memref<32x48xbf16, #tpu.memory_space<vmem>>, %arg2: memref<48x32xbf16, #tpu.memory_space<vmem>>, %arg3: memref<1x32xf32, #tpu.memory_space<vmem>>, %arg4: memref<32x32xf32, #tpu.memory_space<vmem>>) attributes {dimension_semantics = [#tpu.dimension_semantics<parallel>], iteration_bounds = array<i64: 1>, scalar_prefetch = 0 : i64, scratch_operands = 0 : i64, tpu.core_type = #tpu.core_type<tc>, window_params = [{transform_indices = @transform_0, window_bounds = array<i64: 32, 48>}, {pipeline_mode = #tpu.pipeline_mode<synchronous>, transform_indices = @transform_1, window_bounds = array<i64: 48, 32>}, {pipeline_mode = #tpu.pipeline_mode<synchronous>, transform_indices = @transform_2, window_bounds = array<i64: 1, 32>}, {transform_indices = @transform_3, window_bounds = array<i64: 32, 32>}]} {
    %c0 = arith.constant 0 : index
    %c0_0 = arith.constant 0 : index
    %0 = vector.load %arg1[%c0, %c0_0] : memref<32x48xbf16, #tpu.memory_space<vmem>>, vector<32x48xbf16>
    %c0_1 = arith.constant 0 : index
    %c0_2 = arith.constant 0 : index
    %1 = vector.load %arg2[%c0_1, %c0_2] : memref<48x32xbf16, #tpu.memory_space<vmem>>, vector<48x32xbf16>
    %cst = arith.constant dense<0.000000e+00> : vector<32x32xf32>
    %2 = tpu.matmul %0, %1, %cst {dimension_numbers = #tpu.dot_dimension_numbers<[1], [0], [0], [1], [0, 0, 1, 1], [], []>} : vector<32x48xbf16>, vector<48x32xbf16>, vector<32x32xf32> -> vector<32x32xf32>
    %c0_3 = arith.constant 0 : index
    %c0_4 = arith.constant 0 : index
    %3 = vector.load %arg3[%c0_3, %c0_4] : memref<1x32xf32, #tpu.memory_space<vmem>>, vector<1x32xf32>
    %4 = vector.broadcast %3 : vector<1x32xf32> to vector<32x32xf32>
    %5 = arith.addf %2, %4 : vector<32x32xf32>
    %c0_5 = arith.constant 0 : index
    %c0_6 = arith.constant 0 : index
    %6 = vector.load %arg4[%c0_5, %c0_6] : memref<32x32xf32, #tpu.memory_space<vmem>>, vector<32x32xf32>
    tpu.vector_store %arg4[%c0_5, %c0_6], %5 {strides = array<i32>} : memref<32x32xf32, #tpu.memory_space<vmem>>, vector<32x32xf32>,
    return
  }
  func.func @transform_0(%arg0: i32) -> (i32, i32) {
    %c0_i32 = arith.constant 0 : i32
    %c0_i32_0 = arith.constant 0 : i32
    return %arg0, %c0_i32 : i32, i32
  }
  func.func @transform_1(%arg0: i32) -> (i32, i32) {
    %c0_i32 = arith.constant 0 : i32
    %c0_i32_0 = arith.constant 0 : i32
    %c0_i32_1 = arith.constant 0 : i32
    return %c0_i32, %c0_i32_0 : i32, i32
  }
  func.func @transform_2(%arg0: i32) -> (i32, i32) {
    %c0_i32 = arith.constant 0 : i32
    %c0_i32_0 = arith.constant 0 : i32
    %c0_i32_1 = arith.constant 0 : i32
    return %c0_i32, %c0_i32_0 : i32, i32
  }
  func.func @transform_3(%arg0: i32) -> (i32, i32) {
    %c0_i32 = arith.constant 0 : i32
    %c0_i32_0 = arith.constant 0 : i32
    return %arg0, %c0_i32 : i32, i32
  }
}

</mosaic_0001>

<bundles_post_ra>
// kernel: tpu_custom_call.1
= control target key start
LH: loop header
LB: loop body
LE: loop exit
PB: predicated region body
PF: predicated region fallthrough
CT: control target
= control target key end

     0   :  { %s215_s0 = inlined_call_operand.vmem [shape: bf16[32,48], index: 0, kind: input, shape index: {}]   ;;  %s216_s1 = inlined_call_operand.vmem [shape: bf16[48,32], index: 1, kind: input, shape index: {}]   ;;  %s217_s2 = inlined_call_operand.vmem [shape: f32[1,32], index: 2, kind: input, shape index: {}]   ;;  %s218_s3 = inlined_call_operand.hbm [shape: f32[32,32], index: 3, kind: output, shape index: {}]  }
   0x1   :  { %v133_v0 = vld [vmem:[%s216_s1 + $0x10] sm:$0xff]  ;;  %v132_v1 = vld [vmem:[%s216_s1 + $0x8] sm:$0xff] }
   0x2   :  { %70 = vmatpush.bf16.msra.mxu0 %v133_v0  ;;  %134 = vmatpush.bf16.msra.mxu1 %v133_v0 }
   0x3   :  { %8 = vsyncpa [#allocation3], 0  ;;  %v131_v2 = vld [vmem:[%s216_s1] sm:$0xff]  ;;  %v130_v4 = vld [vmem:[%s215_s0 + $0x8] sm:$0xff]  ;;  %vm58_vm0 = vcmask 392192   ;;  %vm84_vm1 = vcmask 261120  }
   0x4   :  { %v129_v3 = vld [vmem:[%s215_s0] sm:$0xff]  ;;  %s167_s1 = smov [#allocation2]   ;;  %s95_s26 = sshll.u32 %s218_s3, 4  ;;  %s96_s26 = int_to_ptr.hbm [resolvable:$true] %s95_s26 }
   0x5   :  { %v140_v5 = vld [vmem:[%s217_s2] ss:$0 sm:$0xff]  ;;  %s93_s0 = sshll.u32 %s167_s1, 4  ;;  %s168_s2 = smov 128   ;;  %s94_s0 = int_to_ptr.vmem [resolvable:$true] %s93_s0 }
   0x6   :  { %71 = vmatpush.bf16.msra.mxu0 %v132_v1  ;;  %135 = vmatpush.bf16.msra.mxu1 %v132_v1  ;;  %s169_s27 = smov 8  }
   0xa   :  { %72 = vmatpush.bf16.msra.mxu0 %v131_v2  ;;  %136 = vmatpush.bf16.msra.mxu1 %v131_v2 }
   0xd   :  { %127 = vmatmul.msk.bf16.vlgmr.msra.gmra.mxu0 %vm58_vm0, %v129_v3  ;;  %128 = vmatmul.msk.bf16.vlgmr.msra.gmra.mxu1 %vm58_vm0, %v130_v4 }
  0x8a   :  { %v74_v6 = vpop.f32.mrf.mxu0  ;;  %v79_v7 = vpop.f32.mrf.mxu1 }
  0x8b   :  { %v75_v8 = vadd.f32 %v140_v5, %v74_v6  ;;  %v80_v9 = vadd.f32 %v140_v5, %v79_v7 }
  0x8d   :  { %85 = vst.msk [vmem:[#allocation2] sm:$0xff] %vm84_vm1, %v75_v8 }
  0x8e   :  { %87 = vst.msk [vmem:[#allocation2 + $0x10] sm:$0xff] %vm84_vm1, %v80_v9 }
  0x92   :  { %v76_v10 = vpop.f32.mrf.mxu0  ;;  %v81_v11 = vpop.f32.mrf.mxu1 }
  0x93   :  { %v77_v12 = vadd.f32 %v140_v5, %v76_v10  ;;  %v82_v13 = vadd.f32 %v140_v5, %v81_v11 }
  0x95   :  { %86 = vst.msk [vmem:[#allocation2 + $0x8] sm:$0xff] %vm84_vm1, %v77_v12 }
  0x96   :  { %88 = vst.msk [vmem:[#allocation2 + $0x18] sm:$0xff] %vm84_vm1, %v82_v13 }
  0x97   :  { %101 = dma.vmem_to_hbm [thread:$0]  %s94_s0, 512, %s96_s26, [#allocation3], %s168_s2, %s168_s2, %s169_s27  }
  0x98   :  { %165 = dma.done.wait [#allocation3], 512  }
  0x99   :  { %166 = vsyncadd [#allocation3], 4294966784 }
  0x9a   :  { %106 = vsyncpa [#allocation3], 1 }

</bundles_post_ra>
